<compile_context>
chip_gen: v5e
topology: v5e:2x2
jax: 0.10.0
libtpu: 0.0.40
codegen_flags: <defaults>
</compile_context>

<pallas_src>
import functools

import jax
import jax.numpy as jnp
from jax.experimental import pallas as pl
from jax.experimental.pallas import tpu as pltpu


# ----------------------------------------------------------------------------- helpers
def _round_up(x, m):
    return (x + m - 1) // m * m


def _pick_tile(full, want, mult):
    """Largest multiple of `mult` that divides `full` and is <= want, else `full`."""
    if full <= want:
        return full
    t = (want // mult) * mult
    while t >= mult:
        if full % t == 0:
            return t
        t -= mult
    return full


def prepare_expert_weights(w1, w2, w3, *, tf=1024, dtype=None):
    """One-time parameter prep (hoist out of the per-step forward).

    PyTorch nn.Linear layout in:
      w1, w3: (E, F, H)    (out, in)
      w2:     (E, H, F)
    Returns chunk-major, row-major-contraction tensors:
      w13: (E, n_f, H, 2*tf)   -- fused [w1^T | w3^T] F-chunks (contiguous DMA slabs)
      w2t: (E, n_f, tf, H)     -- w2^T F-chunks
    Optionally casts to `dtype` (e.g. bf16 for MXU-peak matmuls); the kernel
    always accumulates in f32.
    """
    E, F_dim, H = w1.shape
    tf_eff = _pick_tile(F_dim, tf, 128)
    n_f = F_dim // tf_eff
    # (E, F, H) -> (E, H, F) -> (E, H, n_f, tf) -> (E, n_f, H, tf)
    w1t = jnp.transpose(w1, (0, 2, 1)).reshape(E, H, n_f, tf_eff).transpose(0, 2, 1, 3)
    w3t = jnp.transpose(w3, (0, 2, 1)).reshape(E, H, n_f, tf_eff).transpose(0, 2, 1, 3)
    w13 = jnp.concatenate([w1t, w3t], axis=-1)                    # (E, n_f, H, 2*tf)
    # (E, H, F) -> (E, F, H) -> (E, n_f, tf, H)
    w2t = jnp.transpose(w2, (0, 2, 1)).reshape(E, n_f, tf_eff, H)
    if dtype is not None:
        w13 = w13.astype(dtype)
        w2t = w2t.astype(dtype)
    return w13, w2t


# ----------------------------------------------------------------------------- kernel
def _moe_kernel(expert_ref, active_ref,          # SMEM scalar prefetch (per tile)
                rw_ref, x_ref, w13_ref, w2_ref,  # inputs
                o_ref,                           # output (per-assignment rows)
                acc_ref):                        # VMEM f32 accumulator (tm, H)
    i = pl.program_id(0)        # assignment tile
    fi = pl.program_id(1)       # F chunk (reduction axis)
    n_f = pl.num_programs(1)

    @pl.when(fi == 0)
    def _init():
        acc_ref[...] = jnp.zeros_like(acc_ref)

    # Slack tiles (pure padding at the end of the grouped layout) skip all work.
    @pl.when(active_ref[i] != 0)
    def _compute():
        w13 = w13_ref[0, 0]                                   # (H, 2*tf)
        w2 = w2_ref[0, 0]                                     # (tf, H)
        tf = w2.shape[0]
        x = x_ref[...]                                        # (tm, H), weight dtype

        ag = jnp.dot(x, w13, preferred_element_type=jnp.float32)   # (tm, 2*tf) f32
        a = ag[:, :tf]
        g = ag[:, tf:]
        h = (a * jax.nn.sigmoid(a)) * g                        # SwiGLU chunk, f32
        # Scale by routing weight on (tm, tf) BEFORE the w2 contraction.
        # Pad rows inside a partial tile carry rw == 0, so they contribute exactly 0.
        h = h * rw_ref[...].astype(jnp.float32)                # (tm, 1) broadcast
        acc_ref[...] += jnp.dot(h.astype(w2.dtype), w2,
                                preferred_element_type=jnp.float32)   # (tm, H) f32

    @pl.when(fi == n_f - 1)
    def _finalize():
        o_ref[...] = acc_ref[...].astype(o_ref.dtype)


# ----------------------------------------------------------------------------- forward
def mixtral_moe_forward(x, gate_w, w13, w2t, top_k, *,
                        tm=512, vmem_limit_bytes=None):
    """Forward with pre-prepared (chunk-major) expert weights.

    x:      (B, S, H)
    gate_w: (E, H)             gate nn.Linear weight (out, in)
    w13:    (E, n_f, H, 2*tf)  fused w1/w3 chunks from prepare_expert_weights
    w2t:    (E, n_f, tf, H)
    Returns (final_hidden_states (B, S, H), router_logits (B*S, E)).
    """
    B, S, H = x.shape
    E, n_f, _, tf2 = w13.shape
    tf = tf2 // 2
    T = B * S
    xf = x.reshape(T, H)

    # --- gating (tiny, plain JAX glue) ---
    router_logits = jnp.dot(xf, gate_w.T)                            # (T, E)
    probs = jax.nn.softmax(router_logits.astype(jnp.float32), axis=-1)
    top_w, top_idx = jax.lax.top_k(probs, top_k)
    top_w = top_w / jnp.sum(top_w, axis=-1, keepdims=True)           # normalized, f32

    # --- grouped routing: sort assignments by expert, pad groups to tm ---
    A = T * top_k
    tm_eff = min(tm, _round_up(A, 8))

    flat_e = top_idx.reshape(-1).astype(jnp.int32)                   # (A,)
    flat_w = top_w.reshape(-1)                                       # (A,) f32
    flat_t = jnp.repeat(jnp.arange(T, dtype=jnp.int32), top_k)       # (A,)

    order = jnp.argsort(flat_e, stable=True)
    se, st, sw = flat_e[order], flat_t[order], flat_w[order]

    counts = jnp.bincount(flat_e, length=E)                          # (E,)
    padded_counts = ((counts + tm_eff - 1) // tm_eff) * tm_eff
    p_off = jnp.concatenate([jnp.zeros((1,), counts.dtype),
                             jnp.cumsum(padded_counts)[:-1]])
    u_off = jnp.concatenate([jnp.zeros((1,), counts.dtype),
                             jnp.cumsum(counts)[:-1]])
    dest = (p_off[se] + (jnp.arange(A, dtype=jnp.int32) - u_off[se])).astype(jnp.int32)

    # Static upper bound on the padded layout:  sum(padded_counts) < A_pad always.
    A_pad = _round_up(A, tm_eff) + E * tm_eff
    n_tiles = A_pad // tm_eff

    token_idx = jnp.zeros((A_pad,), jnp.int32).at[dest].set(st)
    rw = jnp.zeros((A_pad,), jnp.float32).at[dest].set(sw)[:, None]  # (A_pad, 1)

    # Per-tile expert id and activity flag (scalar-prefetched into SMEM).
    tile_starts = jnp.arange(n_tiles, dtype=jnp.int32) * tm_eff
    seg_end = jnp.cumsum(padded_counts)                              # (E,)
    tile_expert = jnp.sum(tile_starts[:, None] >= seg_end[None, :], axis=1)
    tile_expert = jnp.minimum(tile_expert, E - 1).astype(jnp.int32)  # (n_tiles,)
    tile_active = (tile_starts < seg_end[-1]).astype(jnp.int32)      # (n_tiles,)

    # Gather routed tokens into a contiguous slab, pre-cast to the matmul dtype.
    xg = xf[token_idx].astype(w13.dtype)                             # (A_pad, H)

    compiler_params = pltpu.CompilerParams(
        dimension_semantics=("parallel", "arbitrary"),
        vmem_limit_bytes=vmem_limit_bytes,
    )

    out_assign = pl.pallas_call(
        _moe_kernel,
        out_shape=jax.ShapeDtypeStruct((A_pad, H), x.dtype),
        grid_spec=pltpu.PrefetchScalarGridSpec(
            num_scalar_prefetch=2,
            grid=(n_tiles, n_f),
            in_specs=[
                pl.BlockSpec((tm_eff, 1), lambda i, f, ex, ac: (i, 0)),       # rw
                pl.BlockSpec((tm_eff, H), lambda i, f, ex, ac: (i, 0)),       # tokens
                pl.BlockSpec((1, 1, H, 2 * tf),                               # fused w1|w3
                             lambda i, f, ex, ac: (ex[i], f, 0, 0)),
                pl.BlockSpec((1, 1, tf, H),                                   # w2
                             lambda i, f, ex, ac: (ex[i], f, 0, 0)),
            ],
            out_specs=pl.BlockSpec((tm_eff, H), lambda i, f, ex, ac: (i, 0)),
            scratch_shapes=[pltpu.VMEM((tm_eff, H), jnp.float32)],
        ),
        compiler_params=compiler_params,
    )(tile_expert, tile_active, rw, xg, w13, w2t)

    # Un-permute: scatter-add each weighted assignment row back to its token.
    # Pad rows are exactly zero (rw == 0) so adding them to token 0 is a no-op.
    final = jnp.zeros((T, H), x.dtype).at[token_idx].add(out_assign)
    return final.reshape(B, S, H), router_logits


def mixtral_sparse_moe_block(x, gate_w, w1, w2, w3, top_k, *,
                             tf=1024, weight_dtype=None, **kwargs):
    """Convenience wrapper accepting PyTorch-layout weights (E,F,H)/(E,H,F)/(E,F,H).

    For repeated forward calls, run `prepare_expert_weights` ONCE at parameter
    prep time (optionally dtype=bf16) and call `mixtral_moe_forward` directly.
    """
    w13, w2t = prepare_expert_weights(w1, w2, w3, tf=tf, dtype=weight_dtype)
    return mixtral_moe_forward(x, gate_w, w13, w2t, top_k, **kwargs)


# ----------------------------------------------------------------------------- reference
def _reference(x, gate_w, w1, w2, w3, top_k):
    """Pure-JAX reference mirroring the PyTorch forward."""
    B, S, H = x.shape
    E = gate_w.shape[0]
    xf = x.reshape(-1, H)
    logits = xf @ gate_w.T
    probs = jax.nn.softmax(logits.astype(jnp.float32), axis=-1)
    tw, ti = jax.lax.top_k(probs, top_k)
    tw = tw / jnp.sum(tw, axis=-1, keepdims=True)
    tw = tw.astype(x.dtype)
    dw = jnp.sum(jax.nn.one_hot(ti, E, dtype=x.dtype) * tw[..., None], axis=1)
    out = jnp.zeros_like(xf)
    for e in range(E):
        h = jax.nn.silu(xf @ w1[e].T) * (xf @ w3[e].T)
        out = out + (h @ w2[e].T) * dw[:, e:e + 1]
    return out.reshape(B, S, H), logits


if __name__ == "__main__":
    B, S, H, F, E, K = 2, 8, 32, 64, 4, 2   # batch, seq, hidden, ffn, experts, top_k

    key = jax.random.PRNGKey(0)
    k1, k2, k3, k4, k5 = jax.random.split(key, 5)
    x = jax.random.normal(k1, (B, S, H), jnp.float32)
    gate_w = jax.random.normal(k2, (E, H), jnp.float32) * 0.1
    w1 = jax.random.normal(k3, (E, F, H), jnp.float32) * (1.0 / H ** 0.5)
    w2 = jax.random.normal(k4, (E, H, F), jnp.float32) * (1.0 / F ** 0.5)
    w3 = jax.random.normal(k5, (E, F, H), jnp.float32) * (1.0 / H ** 0.5)

    out, router_logits = mixtral_sparse_moe_block(x, gate_w, w1, w2, w3, K)
    jax.block_until_ready(out)

    ref_out, ref_logits = _reference(x, gate_w, w1, w2, w3, K)
    assert jnp.allclose(out, ref_out, atol=1e-4, rtol=1e-4), float(
        jnp.max(jnp.abs(out - ref_out)))
    assert jnp.allclose(router_logits, ref_logits, atol=1e-5, rtol=1e-5)

    print("KERNEL_OK")
</pallas_src>

<mosaic_0001>
module attributes {stable_mosaic.version = 11 : i64} {
  func.func @_moe_kernel(%arg0: i32, %arg1: i32, %arg2: memref<5xi32, #tpu.memory_space<smem>>, %arg3: memref<5xi32, #tpu.memory_space<smem>>, %arg4: memref<32x1xf32, #tpu.memory_space<vmem>>, %arg5: memref<32x32xf32, #tpu.memory_space<vmem>>, %arg6: memref<1x1x32x128xf32, #tpu.memory_space<vmem>>, %arg7: memref<1x1x64x32xf32, #tpu.memory_space<vmem>>, %arg8: memref<32x32xf32, #tpu.memory_space<vmem>>, %arg9: memref<32x32xf32, #tpu.memory_space<vmem>>) attributes {dimension_semantics = [#tpu.dimension_semantics<parallel>, #tpu.dimension_semantics<arbitrary>], iteration_bounds = array<i64: 5, 1>, scalar_prefetch = 2 : i64, scratch_operands = 1 : i64, tpu.core_type = #tpu.core_type<tc>, window_params = [{transform_indices = @transform_0, window_bounds = array<i64: 32, 1>}, {transform_indices = @transform_1, window_bounds = array<i64: 32, 32>}, {transform_indices = @transform_2, window_bounds = array<i64: 1, 1, 32, 128>}, {transform_indices = @transform_3, window_bounds = array<i64: 1, 1, 64, 32>}, {transform_indices = @transform_4, window_bounds = array<i64: 32, 32>}]} {
    %c0_i32 = arith.constant 0 : i32
    %0 = arith.cmpi eq, %arg1, %c0_i32 : i32
    %1 = arith.extui %0 : i1 to i32
    %c0_i32_0 = arith.constant 0 : i32
    %2 = arith.cmpi ne, %1, %c0_i32_0 : i32
    scf.if %2 {
      %cst = arith.constant 0.000000e+00 : f32
      %11 = vector.broadcast %cst : f32 to vector<32x32xf32>
      %c0 = arith.constant 0 : index
      %c0_5 = arith.constant 0 : index
      %12 = vector.load %arg9[%c0, %c0_5] : memref<32x32xf32, #tpu.memory_space<vmem>>, vector<32x32xf32>
      tpu.vector_store %arg9[%c0, %c0_5], %11 {strides = array<i32>} : memref<32x32xf32, #tpu.memory_space<vmem>>, vector<32x32xf32>,
    } else {
    }
    %3 = arith.index_cast %arg0 : i32 to index
    %4 = memref.load %arg3[%3] : memref<5xi32, #tpu.memory_space<smem>>
    %c0_i32_1 = arith.constant 0 : i32
    %5 = arith.cmpi ne, %4, %c0_i32_1 : i32
    %6 = arith.extui %5 : i1 to i32
    %c0_i32_2 = arith.constant 0 : i32
    %7 = arith.cmpi ne, %6, %c0_i32_2 : i32
    scf.if %7 {
      %c0 = arith.constant 0 : index
      %c0_5 = arith.constant 0 : index
      %c0_6 = arith.constant 0 : index
      %c0_7 = arith.constant 0 : index
      %11 = vector.load %arg6[%c0, %c0_5, %c0_6, %c0_7] : memref<1x1x32x128xf32, #tpu.memory_space<vmem>>, vector<1x1x32x128xf32>
      %12 = vector.shape_cast %11 : vector<1x1x32x128xf32> to vector<32x128xf32>
      %c0_8 = arith.constant 0 : index
      %c0_9 = arith.constant 0 : index
      %c0_10 = arith.constant 0 : index
      %c0_11 = arith.constant 0 : index
      %13 = vector.load %arg7[%c0_8, %c0_9, %c0_10, %c0_11] : memref<1x1x64x32xf32, #tpu.memory_space<vmem>>, vector<1x1x64x32xf32>
      %14 = vector.shape_cast %13 : vector<1x1x64x32xf32> to vector<64x32xf32>
      %c0_12 = arith.constant 0 : index
      %c0_13 = arith.constant 0 : index
      %15 = vector.load %arg5[%c0_12, %c0_13] : memref<32x32xf32, #tpu.memory_space<vmem>>, vector<32x32xf32>
      %cst = arith.constant dense<0.000000e+00> : vector<32x128xf32>
      %16 = tpu.matmul %15, %12, %cst {dimension_numbers = #tpu.dot_dimension_numbers<[1], [0], [0], [1], [0, 0, 1, 1], [], []>} : vector<32x32xf32>, vector<32x128xf32>, vector<32x128xf32> -> vector<32x128xf32>
      %17 = vector.extract_strided_slice %16 {offsets = [0, 0], sizes = [32, 64], strides = [1, 1]} : vector<32x128xf32> to vector<32x64xf32>
      %18 = vector.extract_strided_slice %16 {offsets = [0, 64], sizes = [32, 64], strides = [1, 1]} : vector<32x128xf32> to vector<32x64xf32>
      %19 = arith.negf %17 : vector<32x64xf32>
      %20 = math.exp %19 : vector<32x64xf32>
      %cst_14 = arith.constant 1.000000e+00 : f32
      %21 = vector.broadcast %cst_14 : f32 to vector<32x64xf32>
      %22 = arith.addf %21, %20 : vector<32x64xf32>
      %23 = arith.divf %21, %22 : vector<32x64xf32>
      %24 = arith.mulf %17, %23 : vector<32x64xf32>
      %25 = arith.mulf %24, %18 : vector<32x64xf32>
      %c0_15 = arith.constant 0 : index
      %c0_16 = arith.constant 0 : index
      %26 = vector.load %arg4[%c0_15, %c0_16] : memref<32x1xf32, #tpu.memory_space<vmem>>, vector<32x1xf32>
      %27 = vector.broadcast %26 : vector<32x1xf32> to vector<32x64xf32>
      %28 = arith.mulf %25, %27 : vector<32x64xf32>
      %c0_17 = arith.constant 0 : index
      %c0_18 = arith.constant 0 : index
      %29 = vector.load %arg9[%c0_17, %c0_18] : memref<32x32xf32, #tpu.memory_space<vmem>>, vector<32x32xf32>
      %cst_19 = arith.constant dense<0.000000e+00> : vector<32x32xf32>
      %30 = tpu.matmul %28, %14, %cst_19 {dimension_numbers = #tpu.dot_dimension_numbers<[1], [0], [0], [1], [0, 0, 1, 1], [], []>} : vector<32x64xf32>, vector<64x32xf32>, vector<32x32xf32> -> vector<32x32xf32>
      %31 = arith.addf %29, %30 : vector<32x32xf32>
      %c0_20 = arith.constant 0 : index
      %c0_21 = arith.constant 0 : index
      %32 = vector.load %arg9[%c0_20, %c0_21] : memref<32x32xf32, #tpu.memory_space<vmem>>, vector<32x32xf32>
      tpu.vector_store %arg9[%c0_20, %c0_21], %31 {strides = array<i32>} : memref<32x32xf32, #tpu.memory_space<vmem>>, vector<32x32xf32>,
    } else {
    }
    %c0_i32_3 = arith.constant 0 : i32
    %8 = arith.cmpi eq, %arg1, %c0_i32_3 : i32
    %9 = arith.extui %8 : i1 to i32
    %c0_i32_4 = arith.constant 0 : i32
    %10 = arith.cmpi ne, %9, %c0_i32_4 : i32
    scf.if %10 {
      %c0 = arith.constant 0 : index
      %c0_5 = arith.constant 0 : index
      %11 = vector.load %arg9[%c0, %c0_5] : memref<32x32xf32, #tpu.memory_space<vmem>>, vector<32x32xf32>
      %c0_6 = arith.constant 0 : index
      %c0_7 = arith.constant 0 : index
      %12 = vector.load %arg8[%c0_6, %c0_7] : memref<32x32xf32, #tpu.memory_space<vmem>>, vector<32x32xf32>
      tpu.vector_store %arg8[%c0_6, %c0_7], %11 {strides = array<i32>} : memref<32x32xf32, #tpu.memory_space<vmem>>, vector<32x32xf32>,
    } else {
    }
    return
  }
  func.func @transform_0(%arg0: i32, %arg1: i32, %arg2: memref<5xi32, #tpu.memory_space<smem>>, %arg3: memref<5xi32, #tpu.memory_space<smem>>) -> (i32, i32) {
    %c0_i32 = arith.constant 0 : i32
    %c0_i32_0 = arith.constant 0 : i32
    return %arg0, %c0_i32 : i32, i32
  }
  func.func @transform_1(%arg0: i32, %arg1: i32, %arg2: memref<5xi32, #tpu.memory_space<smem>>, %arg3: memref<5xi32, #tpu.memory_space<smem>>) -> (i32, i32) {
    %c0_i32 = arith.constant 0 : i32
    %c0_i32_0 = arith.constant 0 : i32
    return %arg0, %c0_i32 : i32, i32
  }
  func.func @transform_2(%arg0: i32, %arg1: i32, %arg2: memref<5xi32, #tpu.memory_space<smem>>, %arg3: memref<5xi32, #tpu.memory_space<smem>>) -> (i32, i32, i32, i32) {
    %0 = arith.index_cast %arg0 : i32 to index
    %1 = memref.load %arg2[%0] : memref<5xi32, #tpu.memory_space<smem>>
    %c0_i32 = arith.constant 0 : i32
    %c0_i32_0 = arith.constant 0 : i32
    %c0_i32_1 = arith.constant 0 : i32
    return %1, %arg1, %c0_i32, %c0_i32_0 : i32, i32, i32, i32
  }
  func.func @transform_3(%arg0: i32, %arg1: i32, %arg2: memref<5xi32, #tpu.memory_space<smem>>, %arg3: memref<5xi32, #tpu.memory_space<smem>>) -> (i32, i32, i32, i32) {
    %0 = arith.index_cast %arg0 : i32 to index
    %1 = memref.load %arg2[%0] : memref<5xi32, #tpu.memory_space<smem>>
    %c0_i32 = arith.constant 0 : i32
    %c0_i32_0 = arith.constant 0 : i32
    %c0_i32_1 = arith.constant 0 : i32
    return %1, %arg1, %c0_i32, %c0_i32_0 : i32, i32, i32, i32
  }
  func.func @transform_4(%arg0: i32, %arg1: i32, %arg2: memref<5xi32, #tpu.memory_space<smem>>, %arg3: memref<5xi32, #tpu.memory_space<smem>>) -> (i32, i32) {
    %c0_i32 = arith.constant 0 : i32
    %c0_i32_0 = arith.constant 0 : i32
    return %arg0, %c0_i32 : i32, i32
  }
}

</mosaic_0001>

<bundles_post_ra>
// kernel: tpu_custom_call.1
= control target key start
LH: loop header
LB: loop body
LE: loop exit
PB: predicated region body
PF: predicated region fallthrough
CT: control target
= control target key end

     0   :  { %s858_s27 = smov [#allocation4]   ;;  %s859_s28 = smov [#allocation5]   ;;  %s1012_s0 = inlined_call_operand.vmem [shape: s32[5], index: 0, kind: input, shape index: {}]   ;;  %s1013_s2 = inlined_call_operand.vmem [shape: f32[160,1], index: 2, kind: input, shape index: {}]   ;;  %s1014_s3 = inlined_call_operand.vmem [shape: f32[160,32], index: 3, kind: input, shape index: {}]   ;;  %s1015_s4 = inlined_call_operand.vmem [shape: f32[4,1,32,128], index: 4, kind: input, shape index: {}]   ;;  %s1016_s5 = inlined_call_operand.vmem [shape: f32[4,1,64,32], index: 5, kind: input, shape index: {}]   ;;  %s1017_s6 = inlined_call_operand.vmem [shape: f32[160,32], index: 6, kind: output, shape index: {}]   ;;  %s1018_s1 = inlined_call_operand.vmem [shape: s32[5], index: 1, kind: input, shape index: {}]  }
   0x1   :  { %s12_s23 = sshll.u32 %s1012_s0, 4  ;;  %s17_s26 = sshll.u32 %s1018_s1, 4  ;;  %s13_s23 = int_to_ptr.vmem [resolvable:$true] %s12_s23  ;;  %s18_s26 = int_to_ptr.vmem [resolvable:$true] %s17_s26 }
   0x2   :  { %15 = dma.vmem_to_smem %s13_s23, 16, %s858_s27, [#allocation3] }
   0x3   :  { %20 = dma.vmem_to_smem %s18_s26, 16, %s859_s28, [#allocation3] }
   0x4   :  { %844 = dma.done.wait [#allocation3], 32 }
   0x5   :  { %845 = vsyncadd [#allocation3], 4294967264 }
   0x6   :  { %23 = sfence }
   0x7   :  { %s904_s29 = smov 0   ;;  %s906_s30 = smov 0  }
   0x8   :  { %s908_s7 = smov 0  }
   0x9 LB: > { %s41_s0 = sadd.s32 1, %s852_s30  ;;  %p721_p0 = scmp.ge.s32.totalorder %s856_s7, 1  ;;  %s856_s7 = sphi %s908_s7, %s29_s7   ;;  %s852_s30 = sphi %s906_s30, %s1020_s30   ;;  %s848_s29 = sphi %s904_s29, %s1019_s29  }
   0xa   : > { %p43_p1 = scmp.ge.s32.totalorder %s41_s0, 5  ;;  %p241_p2 = scmp.lt.s32.totalorder %s856_s7, 6 }
   0xc   : > { %s1022_s0 = smov (%p43_p1, %s41_s0), 0  ;;  %p242_p3 = pnand %p721_p0, %p241_p2 }
   0xd   : > { %s722_s1 = sshll.u32 (!%p242_p3), %s848_s29, 2  ;;  %s304_s8 = sld [smem:[#allocation4 + %s848_s29]] (!%p242_p3) }
   0xe   : > { %245 = sbr.rel (%p242_p3) target bundleno = 455 (0x1c7), region = 36  ;;  %p293_p4 = scmp.lt.s32.totalorder (!%p242_p3), %s722_s1, 19 }
   0xf   : > { %s315_s9 = sld [smem:[#allocation4 + %s848_s29]] (!%p242_p3) }
  0x10   : > { %s341_s10 = sld [smem:[#allocation5 + %s848_s29]] (!%p242_p3) }
  0x13   : > { %vm336_vm0 = vcmask 261120   ;;  %v860_v0 = vmov 0.0   ;;  %s1024_s1 = smov (!%p293_p4, %s722_s1), 19  ;;  %p305_p5 = scmp.lt.s32.totalorder %s304_s8, 3 }
  0x14   : > { %337 = vst.msk [vmem:[#allocation2] sm:$0xff] %vm336_vm0, %v860_v0  ;;  %s723_s11 = sshll.u32 %s1024_s1, 3 }
  0x15   : > { %338 = vst.msk [vmem:[#allocation2 + $0x8] sm:$0xff] %vm336_vm0, %v860_v0  ;;  %s929_s14 = scalar_lea.vmem %s1013_s2, %s723_s11  ;;  %s302_s17 = scalar_lea.vmem %s1014_s3, %s723_s11 }
  0x16   : > { %339 = vst.msk [vmem:[#allocation2 + $0x10] sm:$0xff] %vm336_vm0, %v860_v0  ;;  %p316_p6 = scmp.lt.s32.totalorder %s315_s9, 3  ;;  %s937_s20 = scalar_lea.vmem %s1017_s6, %s723_s11 }
  0x17   : > { %340 = vst.msk [vmem:[#allocation2 + $0x18] sm:$0xff] %vm336_vm0, %v860_v0  ;;  %s1026_s8 = smov (!%p305_p5, %s304_s8), 3  ;;  %p732_p7 = scmp.eq.s32.totalorder %s341_s10, 0 }
  0x18   : > { %s1028_s9 = smov (!%p316_p6, %s315_s9), 3  ;;  %s747_s21 = sshll.u32 %s1026_s8, 5 }
  0x19   : > { %s313_s24 = scalar_lea.vmem %s1015_s4, %s747_s21  ;;  %s748_s25 = sshll.u32 %s1028_s9, 6 }
  0x1a   : > { %s945_s28 = scalar_lea.vmem %s1016_s5, %s748_s25  ;;  %345 = sbr.rel (%p732_p7) target bundleno = 447 (0x1bf), region = 44 }
  0x1b   : > { %s862_s29 = smov (!%p732_p7), 64  }
  0x1f   : > { %v349_v1 = vld [vmem:[%s313_s24 + $0x18] sm:$0xff]  ;;  %v348_v2 = vld [vmem:[%s313_s24 + $0x10] sm:$0xff]  ;;  %v347_v3 = vld [vmem:[%s313_s24 + $0x8] sm:$0xff]  ;;  %v861_v9 = vmov 0   ;;  %vm536_vm5 = vcmask 523264  }
  0x20   : > { %387 = vmatpush.msra.mxu0 %v349_v1  ;;  %749 = vmatpush.msra.mxu3 %v349_v1  ;;  %v346_v4 = vld [vmem:[%s313_s24] sm:$0xff]  ;;  %v359_v6 = vld [vmem:[%s302_s17 + $0x8] sm:$0xff]  ;;  %v360_v7 = vld [vmem:[%s302_s17 + $0x10] sm:$0xff] }
  0x21   : > { %v358_v5 = vld [vmem:[%s302_s17] sm:$0xff]  ;;  %v361_v8 = vld [vmem:[%s302_s17 + $0x18] sm:$0xff]  ;;  %790 = vset.pattern.permute.xlu0 %v861_v9  ;;  %791 = vset.pattern.permute.xlu2 %v861_v9  ;;  %v505_v14 = vld [vmem:[%s929_s14 + $0x8] sm:$0xff] }
  0x22   : > { %388 = vmatpush.msra.mxu0 %v348_v2  ;;  %750 = vmatpush.msra.mxu3 %v348_v2  ;;  %v504_v10 = vld [vmem:[%s929_s14] sm:$0xff]  ;;  %v507_v12 = vld [vmem:[%s929_s14 + $0x18] sm:$0xff]  ;;  %v356_v17 = vld [vmem:[%s945_s28 + $0x30] sm:$0xff] }
  0x23   : > { %510 = vperm.xlu2 %791, %v504_v10   ;;  %v357_v16 = vld [vmem:[%s945_s28 + $0x38] sm:$0xff]  ;;  %v506_v18 = vld [vmem:[%s929_s14 + $0x10] sm:$0xff]  ;;  %v355_v19 = vld [vmem:[%s945_s28 + $0x28] sm:$0xff] }
  0x24   : > { %389 = vmatpush.msra.mxu0 %v347_v3  ;;  %751 = vmatpush.msra.mxu3 %v347_v3  ;;  %v354_v21 = vld [vmem:[%s945_s28 + $0x20] sm:$0xff]  ;;  %v353_v22 = vld [vmem:[%s945_s28 + $0x18] sm:$0xff]  ;;  %v352_v23 = vld [vmem:[%s945_s28 + $0x10] sm:$0xff] }
  0x25   : > { %557 = vmatpush.msra.mxu1 %v357_v16  ;;  %753 = vmatpush.msra.mxu2 %v357_v16  ;;  %v351_v27 = vld [vmem:[%s945_s28 + $0x8] sm:$0xff]  ;;  %v350_v29 = vld [vmem:[%s945_s28] sm:$0xff] }
  0x26   : > { %390 = vmatpush.msra.mxu0 %v346_v4  ;;  %752 = vmatpush.msra.mxu3 %v346_v4 }
  0x27   : > { %733 = vmatmul.msk.f32.vlgmr.msra.gmra.mxu0 %vm336_vm0, %v358_v5  ;;  %734 = vmatmul.msk.f32.vlgmr.msra.gmra.mxu3 %vm336_vm0, %v359_v6 }
  0x28   : > { %558 = vmatpush.msra.mxu1 %v356_v17  ;;  %754 = vmatpush.msra.mxu2 %v356_v17 }
  0x2a   : > { %559 = vmatpush.msra.mxu1 %v355_v19  ;;  %755 = vmatpush.msra.mxu2 %v355_v19 }
  0x2b   : > { %525 = vperm.xlu2 %791, %v507_v12  }
  0x2c   : > { %560 = vmatpush.msra.mxu1 %v354_v21  ;;  %756 = vmatpush.msra.mxu2 %v354_v21 }
  0x2e   : > { %561 = vmatpush.msra.mxu1 %v353_v22  ;;  %757 = vmatpush.msra.mxu2 %v353_v22 }
  0x2f   : > { %735 = vmatmul.msk.f32.gmra.mxu3 %vm336_vm0, %v360_v7 }
  0x30   : > { %562 = vmatpush.msra.mxu1 %v352_v23  ;;  %758 = vmatpush.msra.mxu2 %v352_v23 }
  0x32   : > { %563 = vmatpush.msra.mxu1 %v351_v27  ;;  %759 = vmatpush.msra.mxu2 %v351_v27 }
  0x33   : > { %515 = vperm.xlu2 %791, %v505_v14  }
  0x34   : > { %564 = vmatpush.msra.mxu1 %v350_v29  ;;  %760 = vmatpush.msra.mxu2 %v350_v29 }
  0x37   : > { %736 = vmatmul.msk.f32.gmra.mxu3 %vm336_vm0, %v361_v8 }
  0x7d   : > { %v511_v53 = vpop.permute.xlu2 %510 }
  0xa4   : > { %v952_v11 = vpop.f32.mrf.mxu0 }
  0xa5   : > { %488 = vrot.lane.b32.xlu1 %v952_v11, %s862_s29  ;;  %v737_v24 = vmul.f32 -1.442695, %v952_v11 }
  0xa7   : > { %792 = vpow2.f32 %v737_v24 }
  0xaa   : > { %v957_v13 = vpop.f32.mrf.mxu3 }
  0xab   : > { %v738_v35 = vmul.f32 -1.442695, %v957_v13 }
  0xad   : > { %v793_v25 = vpop.eup %792 }
  0xae   : > { %v416_v26 = vadd.f32 1.0, %v793_v25 }
  0xb0   : > { %794 = vrcp.f32 %v416_v26  ;;  %vm425_vm1 = vweird.f32 %v416_v26  ;;  %v431_v39 = vand.u32 2147483648, %v416_v26  ;;  %v429_v41 = vand.u32 2147483647, %v416_v26 }
  0xb2   : > { %v960_v15 = vpop.f32.mrf.mxu3  ;;  %v432_v44 = vor.u32 1.1754944e-38, %v431_v39  ;;  %vm430_vm4 = vcmp.eq.f32.partialorder %v429_v41, 8.507059e+37  ;;  %v533_v41 = vld [vmem:[#allocation2 + $0x8] sm:$0xff] }
  0xb3   : > { %492 = vrot.lane.b32.xlu0 %v960_v15, %s862_s29  ;;  %v739_v28 = vmul.f32 -1.442695, %v960_v15 }
  0xb5   : > { %796 = vpow2.f32 %v739_v28 }
  0xb6   : > { %v795_v30 = vpop.eup %794 }
  0xb7   : > { %v421_v31 = vmul.f32 %v795_v30, %v416_v26  ;;  %vm426_vm2 = vweird.f32 %v795_v30 }
  0xb8   : > { %vm427_vm3 = vmor %vm425_vm1, %vm426_vm2 }
  0xb9   : > { %v422_v34 = vsub.f32 1.0, %v421_v31 }
  0xba   : > { %v968_v20 = vpop.f32.mrf.mxu3 }
  0xbb   : > { %520 = vperm.xlu0 %790, %v506_v18   ;;  %494 = vrot.lane.b32.xlu1 %v968_v20, %s862_s29  ;;  %v740_v32 = vmul.f32 -1.442695, %v968_v20  ;;  %v797_v33 = vpop.eup %796  ;;  %v423_v37 = vmul.f32 %v795_v30, %v422_v34  ;;  %v526_v18 = vpop.permute.xlu2 %525 }
  0xbc   : > { %v418_v36 = vadd.f32 1.0, %v797_v33 }
  0xbd   : > { %798 = vpow2.f32 %v740_v32  ;;  %v424_v40 = vadd.f32 %v795_v30, %v423_v37 }
  0xbe   : > { %800 = vpow2.f32 %v738_v35  ;;  %v461_v63 = vand.u32 2147483648, %v418_v36  ;;  %vm455_vm7 = vweird.f32 %v418_v36  ;;  %v459_v1 = vand.u32 2147483647, %v418_v36 }
  0xbf   : > { %802 = vrcp.f32 %v418_v36  ;;  %v428_v45 = vsel %vm427_vm3, %v795_v30, %v424_v40 }
  0xc0   : > { %v433_v48 = vsel %vm430_vm4, %v432_v44, %v428_v45  ;;  %v462_v5 = vor.u32 1.1754944e-38, %v461_v63  ;;  %vm460_vm10 = vcmp.eq.f32.partialorder %v459_v1, 8.507059e+37 }
  0xc1   : > { %v480_v50 = vmul.f32 %v433_v48, %v952_v11 }
  0xc3   : > { %490 = vrot.lane.b32.xlu1 %v957_v13, %s862_s29  ;;  %v799_v38 = vpop.eup %798  ;;  %v516_v34 = vpop.permute.xlu2 %515 }
  0xc4   : > { %v419_v42 = vadd.f32 1.0, %v799_v38  ;;  %v801_v43 = vpop.eup %800 }
  0xc5   : > { %v803_v46 = vpop.eup %802  ;;  %v417_v47 = vadd.f32 1.0, %v801_v43  ;;  %v535_v43 = vld [vmem:[#allocation2 + $0x18] sm:$0xff] }
  0xc6   : > { %804 = vrcp.f32 %v419_v42  ;;  %v451_v49 = vmul.f32 %v803_v46, %v418_v36  ;;  %vm456_vm6 = vweird.f32 %v803_v46  ;;  %v476_v8 = vand.u32 2147483648, %v419_v42  ;;  %v532_v36 = vld [vmem:[#allocation2] sm:$0xff] }
  0xc7   : > { %806 = vrcp.f32 %v417_v47  ;;  %vm457_vm8 = vmor %vm455_vm7, %vm456_vm6  ;;  %vm470_vm11 = vweird.f32 %v419_v42  ;;  %v474_v10 = vand.u32 2147483647, %v419_v42  ;;  %v446_v17 = vand.u32 2147483648, %v417_v47 }
  0xc8   : > { %v452_v55 = vsub.f32 1.0, %v451_v49  ;;  %v477_v16 = vor.u32 1.1754944e-38, %v476_v8  ;;  %vm440_vm15 = vweird.f32 %v417_v47  ;;  %v444_v21 = vand.u32 2147483647, %v417_v47 }
  0xc9   : > { %vm475_vm14 = vcmp.eq.f32.partialorder %v474_v10, 8.507059e+37  ;;  %v447_v27 = vor.u32 1.1754944e-38, %v446_v17 }
  0xca   : > { %v453_v59 = vmul.f32 %v803_v46, %v452_v55  ;;  %vm445_vm2 = vcmp.eq.f32.partialorder %v444_v21, 8.507059e+37 }
  0xcc   : > { %v805_v51 = vpop.eup %804  ;;  %v454_v62 = vadd.f32 %v803_v46, %v453_v59 }
  0xcd   : > { %v466_v56 = vmul.f32 %v805_v51, %v419_v42  ;;  %v807_v58 = vpop.eup %806  ;;  %vm471_vm9 = vweird.f32 %v805_v51 }
  0xce   : > { %v436_v61 = vmul.f32 %v807_v58, %v417_v47  ;;  %v458_v3 = vsel %vm457_vm8, %v803_v46, %v454_v62  ;;  %vm472_vm12 = vmor %vm470_vm11, %vm471_vm9  ;;  %vm441_vm13 = vweird.f32 %v807_v58 }
  0xcf   : > { %v467_v60 = vsub.f32 1.0, %v466_v56  ;;  %v463_v9 = vsel %vm460_vm10, %v462_v5, %v458_v3  ;;  %vm442_vm1 = vmor %vm440_vm15, %vm441_vm13 }
  0xd0   : > { %v437_v2 = vsub.f32 1.0, %v436_v61  ;;  %v482_v12 = vmul.f32 %v463_v9, %v960_v15 }
  0xd1   : > { %v468_v0 = vmul.f32 %v805_v51, %v467_v60 }
  0xd2   : > { %v438_v7 = vmul.f32 %v807_v58, %v437_v2 }
  0xd3   : > { %v469_v6 = vadd.f32 %v805_v51, %v468_v0 }
  0xd4   : > { %v439_v14 = vadd.f32 %v807_v58, %v438_v7 }
  0xd5   : > { %v473_v11 = vsel %vm472_vm12, %v805_v51, %v469_v6 }
  0xd6   : > { %v478_v22 = vsel %vm475_vm14, %v477_v16, %v473_v11  ;;  %v443_v26 = vsel %vm442_vm1, %v807_v58, %v439_v14 }
  0xd7   : > { %v483_v28 = vmul.f32 %v478_v22, %v968_v20  ;;  %v448_v15 = vsel %vm445_vm2, %v447_v27, %v443_v26  ;;  %v534_v20 = vld [vmem:[#allocation2 + $0x10] sm:$0xff] }
  0xd8   : > { %v481_v30 = vmul.f32 %v448_v15, %v957_v13 }
 0x117   : > { %v489_v52 = vpop.permute.xlu1 %488 }
 0x118   : > { %v500_v54 = vmul.f32 %v489_v52, %v480_v50 }
 0x11a   : > { %v528_v57 = vmul.f32 %v511_v53, %v500_v54 }
 0x11c   : > { %741 = vmatmul.msk.f32.vlgmr.msra.gmra.mxu1 %vm536_vm5, %v528_v57 }
 0x125   : > { %v493_v4 = vpop.permute.xlu0 %492 }
 0x126   : > { %v502_v19 = vmul.f32 %v493_v4, %v482_v12 }
 0x12d   : > { %v521_v23 = vpop.permute.xlu0 %520  ;;  %v495_v24 = vpop.permute.xlu1 %494 }
 0x12e   : > { %v530_v25 = vmul.f32 %v521_v23, %v502_v19  ;;  %v503_v29 = vmul.f32 %v495_v24, %v483_v28 }
 0x130   : > { %743 = vmatmul.msk.f32.vlgmr.msra.gmra.mxu2 %vm536_vm5, %v530_v25  ;;  %v531_v32 = vmul.f32 %v526_v18, %v503_v29 }
 0x135   : > { %v491_v31 = vpop.permute.xlu1 %490 }
 0x136   : > { %v501_v33 = vmul.f32 %v491_v31, %v481_v30 }
 0x138   : > { %v529_v35 = vmul.f32 %v516_v34, %v501_v33  ;;  %744 = vmatmul.msk.f32.gmra.mxu2 %vm536_vm5, %v531_v32 }
 0x13a   : > { %742 = vmatmul.msk.f32.gmra.mxu1 %vm536_vm5, %v529_v35 }
 0x199   : > { %v566_v37 = vpop.f32.mrf.mxu1 }
 0x19a   : > { %v578_v38 = vadd.f32 %v566_v37, %v532_v36 }
 0x19c   : > { %582 = vst.msk [vmem:[#allocation2] sm:$0xff] %vm336_vm0, %v578_v38 }
 0x1b3   : > { %v572_v39 = vpop.f32.mrf.mxu2 }
 0x1b4   : > { %v580_v40 = vadd.f32 %v572_v39, %v534_v20 }
 0x1b6   : > { %584 = vst.msk [vmem:[#allocation2 + $0x10] sm:$0xff] %vm336_vm0, %v580_v40 }
 0x1b7   : > { %v569_v13 = vpop.f32.mrf.mxu1 }
 0x1b8   : > { %v579_v42 = vadd.f32 %v569_v13, %v533_v41 }
 0x1ba   : > { %583 = vst.msk [vmem:[#allocation2 + $0x8] sm:$0xff] %vm336_vm0, %v579_v42 }
 0x1bb   : > { %v575_v44 = vpop.f32.mrf.mxu2 }
 0x1bc   : > { %v581_v45 = vadd.f32 %v575_v44, %v535_v43 }
 0x1be   : > { %585 = vst.msk [vmem:[#allocation2 + $0x18] sm:$0xff] %vm336_vm0, %v581_v45 }
 0x1bf PF: > { %v589_v46 = vld [vmem:[#allocation2] sm:$0xff]  ;;  %v591_v48 = vld [vmem:[#allocation2 + $0x10] sm:$0xff] }
 0x1c0   : > { %594 = vst.msk [vmem:[%s937_s20] sm:$0xff] %vm336_vm0, %v589_v46 }
 0x1c1   : > { %v590_v47 = vld [vmem:[#allocation2 + $0x8] sm:$0xff]  ;;  %596 = vst.msk [vmem:[%s937_s20 + $0x10] sm:$0xff] %vm336_vm0, %v591_v48 }
 0x1c2   : > { %595 = vst.msk [vmem:[%s937_s20 + $0x8] sm:$0xff] %vm336_vm0, %v590_v47 }
 0x1c5   : > { %v592_v49 = vld [vmem:[#allocation2 + $0x18] sm:$0xff] }
 0x1c6   : > { %597 = vst.msk [vmem:[%s937_s20 + $0x18] sm:$0xff] %vm336_vm0, %v592_v49 }
 0x1c7 PF: > { %s29_s7 = sadd.s32 1, %s856_s7   ;;  %s1019_s29 = smov %s852_s30 }
 0x1c8   : > { %p26_p8 = scmp.ge.s32.totalorder %s29_s7, 7   ;;  %s1020_s30 = smov %s1022_s0 }
 0x1ca   :  { %28 = sbr.rel (!%p26_p8) target bundleno = 9 (0x9), region = 87 }

</bundles_post_ra>
